<compile_context>
chip_gen: v6e
topology: v6e:2x2x1
jax: 0.10.0
libtpu: 0.0.40
codegen_flags: <defaults>
</compile_context>

<pallas_src>
import functools

import jax
import jax.numpy as jnp
from jax.experimental import pallas as pl
from jax.experimental.pallas import tpu as pltpu

BIT = 8
SYMMETRIC = False
QUANT_MIN = -(2 ** (BIT - 1)) if SYMMETRIC else 0
QUANT_MAX = (2 ** (BIT - 1) - 1) if SYMMETRIC else (2 ** BIT - 1)

_TARGET_BLOCK_BYTES = 4 * 1024 * 1024  # ~4 MiB per block buffer (x2 dbl-buffer, x2 in/out)


def _lsq_plus_fq_kernel(scale_ref, zp_ref, x_ref, o_ref, *, quant_min, quant_max):
    """Per-tensor LSQ+ fake quantization on one (block_rows, lane) VMEM tile."""
    eps = jnp.float32(jnp.finfo(jnp.float32).eps)
    # scalar param sanitation (matches scale.abs_().clamp_(min=eps) and
    # zero_point.clamp_(quant_min, quant_max) in the PyTorch forward)
    s = jnp.maximum(jnp.abs(scale_ref[0]), eps)
    zp = jnp.clip(zp_ref[0], jnp.float32(quant_min), jnp.float32(quant_max))
    zp_r = jnp.round(zp)                       # forward value of the STE-rounded zp
    inv_s = jnp.float32(1.0) / s               # hoisted scalar reciprocal (once/tile)

    x = x_ref[...].astype(jnp.float32)         # in-kernel cast; HBM stays narrow
    q = jnp.clip(jnp.round(x * inv_s + zp_r),
                 jnp.float32(quant_min), jnp.float32(quant_max))
    o_ref[...] = ((q - zp_r) * s).astype(o_ref.dtype)


def _choose_slab(n, itemsize):
    """Pick (rows, lane, block_rows, padded_n) for a lane-dense 2D slab."""
    # Widest lane dim (multiple of 128, up to 2048) that divides n -> no padding pass.
    lane = None
    for w in (2048, 1024, 512, 256, 128):
        if n % w == 0:
            lane = w
            break
    if lane is None:
        lane = 512                              # ragged numel: pad up to lane width

    rows = -(-n // lane)                        # cdiv

    # ~4 MiB per block buffer; block_rows a multiple of 32 (layout-safe for
    # f32 / bf16 / int8 sublane packing).
    target_rows = max(32, (_TARGET_BLOCK_BYTES // (itemsize * lane)) // 32 * 32)

    if rows <= target_rows:
        block_rows = rows                       # block == full array dims (always legal)
    else:
        block_rows = target_rows
        rows = -(-rows // block_rows) * block_rows   # pad rows to a block multiple

    return rows, lane, block_rows, rows * lane


def lsq_plus_fake_quantize(x, scale, zero_point,
                           quant_min=QUANT_MIN, quant_max=QUANT_MAX):
    """Wrapper: present a wide lane-dense 2D slab, run Pallas kernel, restore shape."""
    orig_shape = x.shape
    dtype = x.dtype
    n = x.size
    itemsize = jnp.dtype(dtype).itemsize

    rows, lane, block_rows, padded_n = _choose_slab(n, itemsize)

    xf = x.reshape(-1)
    if padded_n != n:
        # TODO(synk): only hit when numel isn't a multiple of 128; could be replaced
        # by an in-kernel masked epilogue to save this extra HBM pass.
        xf = jnp.pad(xf, (0, padded_n - n))
    x2 = xf.reshape(rows, lane)

    scale = jnp.asarray(scale, jnp.float32).reshape(-1)
    zero_point = jnp.asarray(zero_point, jnp.float32).reshape(-1)

    out = pl.pallas_call(
        functools.partial(_lsq_plus_fq_kernel,
                          quant_min=quant_min, quant_max=quant_max),
        out_shape=jax.ShapeDtypeStruct((rows, lane), dtype),   # native dtype out
        grid=(rows // block_rows,),
        in_specs=[
            pl.BlockSpec(memory_space=pltpu.MemorySpace.SMEM),   # scale      (1,)
            pl.BlockSpec(memory_space=pltpu.MemorySpace.SMEM),   # zero_point (1,)
            pl.BlockSpec((block_rows, lane), lambda i: (i, 0)),  # x tile
        ],
        out_specs=pl.BlockSpec((block_rows, lane), lambda i: (i, 0)),
        compiler_params=pltpu.CompilerParams(
            dimension_semantics=("parallel",),
            vmem_limit_bytes=32 * 1024 * 1024,
        ),
    )(scale, zero_point, x2)

    out = out.reshape(-1)
    if padded_n != n:
        out = out[:n]
    return out.reshape(orig_shape)


def _reference(x, scale, zero_point, quant_min=QUANT_MIN, quant_max=QUANT_MAX):
    """Pure-JAX reference of the PyTorch forward (fake_quant path).

    Uses the same hoisted-reciprocal formulation as the kernel (x * (1/s)),
    which can differ from torch's x / s by <= 1 ulp before rounding.
    """
    eps = jnp.finfo(jnp.float32).eps
    s = jnp.maximum(jnp.abs(jnp.asarray(scale, jnp.float32)[0]), eps)
    zp = jnp.clip(jnp.asarray(zero_point, jnp.float32)[0], quant_min, quant_max)
    zp_r = jnp.round(zp)
    xf = x.astype(jnp.float32)
    q = jnp.clip(jnp.round(xf * (1.0 / s) + zp_r), quant_min, quant_max)
    return ((q - zp_r) * s).astype(x.dtype)


if __name__ == "__main__":
    key = jax.random.PRNGKey(0)
    k1, k2 = jax.random.split(key)

    # NCHW float32 input, consistent with conv-style usage of the module.
    # Parameter shapes match the module __init__: scale=[1.0], zero_point=[0.0],
    # perturbed so the affine path is actually exercised.
    x = jax.random.normal(k1, (2, 4, 16, 16), dtype=jnp.float32)
    scale = jnp.array([0.05], dtype=jnp.float32)
    zero_point = jnp.array([3.7], dtype=jnp.float32)

    # TODO(synk): observer_enabled==1 path (MinMaxObserver running stats + qparam
    # recomputation) is stateful module bookkeeping, not part of the hot path;
    # only the observer-disabled / fake-quant-enabled forward is implemented.

    out = jax.block_until_ready(lsq_plus_fake_quantize(x, scale, zero_point))
    ref = _reference(x, scale, zero_point)
    assert out.shape == x.shape and out.dtype == x.dtype
    assert jnp.allclose(out, ref, atol=1e-6, rtol=1e-6)

    # bf16 input with ragged numel: exercises the padding path and the
    # narrow-dtype-in-HBM / f32-in-kernel cast path.
    xb = jax.random.normal(k2, (3, 5, 7, 11), dtype=jnp.float32).astype(jnp.bfloat16)
    outb = jax.block_until_ready(lsq_plus_fake_quantize(xb, scale, zero_point))
    refb = _reference(xb, scale, zero_point)
    assert outb.shape == xb.shape and outb.dtype == xb.dtype
    assert jnp.allclose(outb.astype(jnp.float32), refb.astype(jnp.float32),
                        atol=1e-6, rtol=1e-6)

    print("KERNEL_OK")
</pallas_src>

<mosaic_0001>
module attributes {stable_mosaic.version = 11 : i64} {
  func.func @_lsq_plus_fq_kernel(%arg0: i32, %arg1: memref<1xf32, #tpu.memory_space<smem>>, %arg2: memref<1xf32, #tpu.memory_space<smem>>, %arg3: memref<1x2048xf32, #tpu.memory_space<vmem>>, %arg4: memref<1x2048xf32, #tpu.memory_space<vmem>>) attributes {dimension_semantics = [#tpu.dimension_semantics<parallel>], iteration_bounds = array<i64: 1>, scalar_prefetch = 0 : i64, scratch_operands = 0 : i64, tpu.core_type = #tpu.core_type<tc>, window_params = [{transform_indices = @transform_0, window_bounds = array<i64: 1>}, {transform_indices = @transform_1, window_bounds = array<i64: 1>}, {transform_indices = @transform_2, window_bounds = array<i64: 1, 2048>}, {transform_indices = @transform_3, window_bounds = array<i64: 1, 2048>}]} {
    %c0 = arith.constant 0 : index
    %0 = memref.load %arg1[%c0] : memref<1xf32, #tpu.memory_space<smem>>
    %1 = math.absf %0 : f32
    %cst = arith.constant 1.1920929E-7 : f32
    %2 = arith.maximumf %1, %cst : f32
    %c0_0 = arith.constant 0 : index
    %3 = memref.load %arg2[%c0_0] : memref<1xf32, #tpu.memory_space<smem>>
    %cst_1 = arith.constant 0.000000e+00 : f32
    %cst_2 = arith.constant 2.550000e+02 : f32
    %4 = arith.maximumf %cst_1, %3 : f32
    %5 = arith.minimumf %cst_2, %4 : f32
    %6 = math.roundeven %5 : f32
    %cst_3 = arith.constant 1.000000e+00 : f32
    %7 = arith.divf %cst_3, %2 : f32
    %c0_4 = arith.constant 0 : index
    %c0_5 = arith.constant 0 : index
    %8 = vector.load %arg3[%c0_4, %c0_5] : memref<1x2048xf32, #tpu.memory_space<vmem>>, vector<1x2048xf32>
    %9 = vector.broadcast %7 : f32 to vector<1x2048xf32>
    %10 = arith.mulf %8, %9 : vector<1x2048xf32>
    %11 = vector.broadcast %6 : f32 to vector<1x2048xf32>
    %12 = arith.addf %10, %11 : vector<1x2048xf32>
    %13 = math.roundeven %12 : vector<1x2048xf32>
    %cst_6 = arith.constant 0.000000e+00 : f32
    %cst_7 = arith.constant 2.550000e+02 : f32
    %14 = vector.broadcast %cst_6 : f32 to vector<1x2048xf32>
    %15 = arith.maximumf %14, %13 : vector<1x2048xf32>
    %16 = vector.broadcast %cst_7 : f32 to vector<1x2048xf32>
    %17 = arith.minimumf %16, %15 : vector<1x2048xf32>
    %18 = vector.broadcast %6 : f32 to vector<1x2048xf32>
    %19 = arith.subf %17, %18 : vector<1x2048xf32>
    %20 = vector.broadcast %2 : f32 to vector<1x2048xf32>
    %21 = arith.mulf %19, %20 : vector<1x2048xf32>
    %c0_8 = arith.constant 0 : index
    %c0_9 = arith.constant 0 : index
    %22 = vector.load %arg4[%c0_8, %c0_9] : memref<1x2048xf32, #tpu.memory_space<vmem>>, vector<1x2048xf32>
    tpu.vector_store %arg4[%c0_8, %c0_9], %21 {strides = array<i32>} : memref<1x2048xf32, #tpu.memory_space<vmem>>, vector<1x2048xf32>,
    return
  }
  func.func @transform_0(%arg0: i32) -> i32 {
    %c0_i32 = arith.constant 0 : i32
    %c0_i32_0 = arith.constant 0 : i32
    return %c0_i32 : i32
  }
  func.func @transform_1(%arg0: i32) -> i32 {
    %c0_i32 = arith.constant 0 : i32
    %c0_i32_0 = arith.constant 0 : i32
    return %c0_i32 : i32
  }
  func.func @transform_2(%arg0: i32) -> (i32, i32) {
    %c0_i32 = arith.constant 0 : i32
    %c0_i32_0 = arith.constant 0 : i32
    return %arg0, %c0_i32 : i32, i32
  }
  func.func @transform_3(%arg0: i32) -> (i32, i32) {
    %c0_i32 = arith.constant 0 : i32
    %c0_i32_0 = arith.constant 0 : i32
    return %arg0, %c0_i32 : i32, i32
  }
}

</mosaic_0001>

<bundles_post_ra>
// kernel: tpu_custom_call.1
= control target key start
LH: loop header
LB: loop body
LE: loop exit
PB: predicated region body
PF: predicated region fallthrough
CT: control target
= control target key end

     0   :  { %10 = vsyncpa [#allocation5], 0  ;;  %s188_s0 = inlined_call_operand.<no memory space> [shape: f32[1], index: 0, kind: input, shape index: {}]   ;;  %s189_s1 = inlined_call_operand.<no memory space> [shape: f32[1], index: 1, kind: input, shape index: {}]   ;;  %s190_s2 = inlined_call_operand.hbm [shape: f32[1,2048], index: 2, kind: input, shape index: {}]   ;;  %s191_s3 = inlined_call_operand.hbm [shape: f32[1,2048], index: 3, kind: output, shape index: {}]  }
   0x1   :  { %11 = vsyncpa [#allocation6], 0  ;;  %s151_s12 = smov [#allocation4]  }
   0x2   :  { %s22_s13 = sshll.u32 %s151_s12, 4  ;;  %s23_s13 = int_to_ptr.vmem [resolvable:$true] %s22_s13 }
   0x3   :  { %s115_s14 = scalar_lea.vmem %s23_s13, 256  ;;  %p120_p1 = scmp.lt.s32.totalorder %s23_s13, %s23_s13 }
   0x4   :  { %p116_p0 = scmp.ne.s32.totalorder %s23_s13, %s115_s14  ;;  %p121_p2 = scmp.lt.s32.totalorder %s115_s14, %s115_s14 }
   0x6   :  { %p122_p3 = por %p121_p2, %p120_p1 }
   0x8   :  { %p123_p4 = pnand %p122_p3, %p116_p0 }
   0xa   :  { %126 = shalt.err (!%p123_p4)
}
   0xb   :  { %25 = dma.hbm_to_vmem [thread:$0]  %s190_s2, 256, %s23_s13, [#allocation5]  }
   0xc   :  { %s30_s19 = sand.u32 2147483647, %s188_s0 }
   0xd   :  { %147 = dma.done.wait [#allocation5], 256  }
   0xe   :  { %148 = vsyncadd [#allocation5], 4294967040  ;;  %s152_s20 = smov 1.1920929e-07   ;;  %s153_s22 = smov 0.0   ;;  %v46_v2 = vld [vmem:[#allocation4] sm:$0xff]  ;;  %v47_v3 = vld [vmem:[#allocation4 + $0x8] sm:$0xff] }
   0xf   :  { %s31_s21 = smax.f32 %s152_s20, %s30_s19  ;;  %s33_s25 = smax.f32 %s153_s22, %s189_s1 }
  0x10   :  { %v43_v0 = vstv %s31_s21  ;;  %s154_s26 = smov 255.0   ;;  %s155_s1 = smov [#allocation7]  }
  0x11   :  { %105 = vrcp.f32 %v43_v0  ;;  %s34_s27 = smin.f32 %s154_s26, %s33_s25  ;;  %s73_s6 = sshll.u32 %s155_s1, 4  ;;  %s74_s6 = int_to_ptr.vmem [resolvable:$true] %s73_s6 }
  0x12   :  { %s35_s2 = scvt.f32.s32 %s34_s27  ;;  %s40_s29 = sand.u32 2147483647, %s34_s27 }
  0x13   :  { %s38_s0 = sand.u32 2147483648, %s34_s27  ;;  %p41_p5 = scmp.lt.f32.partialorder %s40_s29, 2.1474836e+09 }
  0x14   :  { %s36_s28 = scvt.s32.f32 %s35_s2  ;;  %s127_s7 = scalar_lea.vmem %s74_s6, 256 }
  0x15   :  { %p128_p6 = scmp.ne.s32.totalorder %s74_s6, %s127_s7  ;;  %p132_p7 = scmp.lt.s32.totalorder %s74_s6, %s74_s6 }
  0x16   :  { %s37_s30 = sand.u32 2147483647, %s36_s28  ;;  %p133_p8 = scmp.lt.s32.totalorder %s127_s7, %s127_s7 }
  0x17   :  { %s39_s4 = sor.u32 %s38_s0, %s37_s30 }
  0x18   :  { %s193_s4 = smov (!%p41_p5, %s39_s4), %s34_s27  ;;  %p134_p9 = por %p133_p8, %p132_p7 }
  0x19   :  { %v51_v5 = vstv %s193_s4 }
  0x1a   :  { %p135_p10 = pnand %p134_p9, %p128_p6 }
  0x1e   :  { %v106_v1 = vpop.eup %105 }
  0x1f   :  { %82 = vpush %v106_v1 }
  0x50   :  { %s83_s5 = spop %82 }
  0x51   :  { %v48_v4 = vstv %s83_s5 }
  0x52   :  { %v49_v6 = vmul.f32 %v48_v4, %v46_v2  ;;  %v50_v7 = vmul.f32 %v48_v4, %v47_v3 }
  0x54   :  { %v52_v8 = vadd.f32 %v51_v5, %v49_v6  ;;  %v53_v9 = vadd.f32 %v51_v5, %v50_v7 }
  0x56   :  { %v86_v10 = vcvt.f32.s32 %v52_v8  ;;  %v94_v11 = vcvt.f32.s32 %v53_v9  ;;  %v84_v13 = vand.u32 2147483647, %v52_v8  ;;  %v89_v16 = vand.u32 2147483648, %v52_v8 }
  0x57   :  { %v92_v17 = vand.u32 2147483647, %v53_v9  ;;  %v97_v19 = vand.u32 2147483648, %v53_v9 }
  0x58   :  { %v87_v12 = vcvt.s32.f32 %v86_v10  ;;  %v95_v14 = vcvt.s32.f32 %v94_v11  ;;  %vm85_vm0 = vcmp.lt.f32.partialorder %v84_v13, 8388608.0 }
  0x59   :  { %vm93_vm1 = vcmp.lt.f32.partialorder %v92_v17, 8388608.0 }
  0x5a   :  { %v88_v15 = vand.u32 2147483647, %v87_v12  ;;  %v96_v18 = vand.u32 2147483647, %v95_v14 }
  0x5c   :  { %v90_v20 = vor.u32 %v89_v16, %v88_v15  ;;  %v98_v21 = vor.u32 %v97_v19, %v96_v18 }
  0x5e   :  { %v91_v22 = vsel %vm85_vm0, %v90_v20, %v52_v8  ;;  %v99_v23 = vsel %vm93_vm1, %v98_v21, %v53_v9 }
  0x5f   :  { %v56_v24 = vmax.f32 %v91_v22, 0.0  ;;  %v57_v25 = vmax.f32 %v99_v23, 0.0 }
  0x61   :  { %v58_v26 = vmin.f32 %v56_v24, 255.0  ;;  %v59_v27 = vmin.f32 %v57_v25, 255.0 }
  0x63   :  { %v60_v28 = vsub.f32 %v58_v26, %v51_v5  ;;  %v61_v29 = vsub.f32 %v59_v27, %v51_v5 }
  0x65   :  { %v63_v30 = vmul.f32 %v60_v28, %v43_v0  ;;  %v64_v31 = vmul.f32 %v61_v29, %v43_v0 }
  0x67   :  { %65 = vst [vmem:[#allocation7] sm:$0xff] %v63_v30  ;;  %66 = vst [vmem:[#allocation7 + $0x8] sm:$0xff] %v64_v31 }
  0x68   :  { %138 = shalt.err (!%p135_p10)
}
  0x69   :  { %76 = dma.vmem_to_hbm [thread:$0]  %s74_s6, 256, %s191_s3, [#allocation6]  }
  0x6a   :  { %149 = dma.done.wait [#allocation6], 256  }
  0x6b   :  { %150 = vsyncadd [#allocation6], 4294967040 }
  0x6c   :  { %80 = vsyncpa [#allocation5], 1 }
  0x6d   :  { %81 = vsyncpa [#allocation6], 1 }

</bundles_post_ra>
